<compile_context>
chip_gen: v7x
topology: tpu7x:2x2x1
jax: 0.10.0
libtpu: 0.0.40
codegen_flags: <defaults>
</compile_context>

<pallas_src>
import jax
import jax.numpy as jnp
from jax.experimental import pallas as pl
from jax.experimental.pallas import tpu as pltpu


# ----------------------------------------------------------------------------
# Tiling / VMEM policy helpers
# ----------------------------------------------------------------------------
def _vmem_policy():
    """(scoped_vmem_limit, per_input_block_budget) in bytes, per generation."""
    cap = 64 << 20  # conservative default = v7x per-core VMEM
    try:
        info = pltpu.get_tpu_info()
        cap = int(getattr(info, "vmem_capacity_bytes", cap)) or cap
    except Exception:
        pass
    # ~70% of physical VMEM, leaving headroom for Mosaic internal scratch,
    # semaphores and the out-spec double buffer.
    limit = max(24 << 20, min(int(cap * 0.70), cap - (16 << 20)))
    budget = max(6 << 20, limit // 4)
    return limit, budget


def _divisor_tile(total, max_tile, quantum):
    """Largest divisor of `total` that is <= max_tile and a multiple of
    `quantum` (the (8,128) layout rule), or `total` itself if it already fits
    / no such divisor exists (a full extent is always layout-legal)."""
    if total <= max_tile:
        return total
    t = (max_tile // quantum) * quantum
    while t >= quantum:
        if total % t == 0:
            return t
        t -= quantum
    return total


def _pick_stage1_tiles(n, cin, hw, itemsize, budget_bytes):
    """(cin_tile, hw_tile) for the (n, cin_tile, hw_tile) Stage-1 input block."""
    elem_budget = max(1024, budget_bytes // max(1, n * itemsize))
    # Aim for >=512 lanes per row; spend the rest of the budget on Cin rows.
    target_cin = max(8, elem_budget // min(hw, 512))
    cin_tile = _divisor_tile(cin, target_cin, 8)
    max_hw = max(128, elem_budget // cin_tile)
    if hw <= max_hw:
        return cin_tile, hw
    hw_tile = max(128, (max_hw // 128) * 128)
    if hw_tile >= hw:
        hw_tile = hw
    return cin_tile, hw_tile


def _pick_stage2_tile(n, cout, hw, itemsize, budget_bytes):
    """Lane-dense H*W tile for the (n, cout, hw_tile) Stage-2 output block."""
    elem_budget = max(128, budget_bytes // max(1, n * cout * itemsize))
    if hw <= elem_budget:
        return hw
    t = max(128, (elem_budget // 128) * 128)
    return hw if t >= hw else t


# ----------------------------------------------------------------------------
# Kernels
# ----------------------------------------------------------------------------
def _make_stage1_kernel(hw_total, hw_tile, hw_blocks_per_p):
    has_tail = (hw_total % hw_tile) != 0

    def kernel(x_ref, w_ref, part_ref):
        # x_ref:    (N, cin_tile, hw_tile)   current (Cin, HW) tile of x
        # w_ref:    (cin_tile, Cout)         conv weight * BN scale / (H*W)
        # part_ref: (1, N, Cout) f32         per-P partial; resident accumulator
        k = pl.program_id(1)
        h = pl.program_id(2)

        @pl.when(jnp.logical_and(k == 0, h == 0))
        def _init():
            part_ref[...] = jnp.zeros_like(part_ref)

        xv = x_ref[...].astype(jnp.float32)
        if has_tail:  # mask padded lanes of the ragged last HW block (exact)
            hw_off = (pl.program_id(0) * hw_blocks_per_p + h) * hw_tile
            lane = jax.lax.broadcasted_iota(jnp.int32, xv.shape, 2)
            xv = jnp.where(lane + hw_off < hw_total, xv, 0.0)

        partial = jnp.sum(xv, axis=2)                       # (N, cin_tile)
        part_ref[...] += jnp.dot(
            partial, w_ref[...], preferred_element_type=jnp.float32)[None]

    return kernel


def _stage2_kernel(parts_ref, b_ref, o_ref):
    # parts_ref: (P, N, Cout) f32  Stage-1 partials (grid-invariant, tiny)
    # b_ref:     (1, Cout)    f32  folded BN bias
    # o_ref:     (N, Cout, hw_tile) lane-dense output chunk
    # The epilogue (sum over P + bias + ReLU) is a few KiB of VPU work per
    # step and hides under the HBM store; recomputing it keeps the grid axis
    # safely "parallel" (megacore-shardable) with no scratch-init hazard.
    y = jnp.maximum(jnp.sum(parts_ref[...], axis=0) + b_ref[...], 0.0)   # (N, Cout)
    o_ref[...] = jnp.broadcast_to(y[:, :, None], o_ref.shape).astype(o_ref.dtype)


# ----------------------------------------------------------------------------
# Wrapper
# ----------------------------------------------------------------------------
def aspp_pooling(x, weight, gamma, beta, running_mean, running_var, eps=1e-5,
                 stage1_tiles=None, stage2_tile=None):
    """ASPPPooling forward.

    x: (N, Cin, H, W); weight: (Cout, Cin) (squeezed 1x1 conv kernel);
    gamma/beta/running_mean/running_var: (Cout,) eval-mode BatchNorm params.
    Returns (N, Cout, H, W).
    """
    N, Cin, H, W = x.shape
    Cout = weight.shape[0]
    HW = H * W
    itemsize = jnp.dtype(x.dtype).itemsize
    vmem_limit, budget = _vmem_policy()

    # Fold eval-mode BN and the 1/(H*W) mean factor into the conv weight/bias.
    scale = gamma.astype(jnp.float32) / jnp.sqrt(running_var.astype(jnp.float32) + eps)
    bias = (beta.astype(jnp.float32) - running_mean.astype(jnp.float32) * scale)
    bias = bias.reshape(1, Cout)
    w_folded = (weight.T.astype(jnp.float32) * scale[None, :]) / float(HW)   # (Cin, Cout)

    # Lane-dense view: spatial dims flattened into the last axis.
    x3 = x.reshape(N, Cin, HW)

    # ---- Stage 1: masked spatial sum + matmul -> (P, N, Cout) f32 partials ----
    if stage1_tiles is None:
        cin_tile, hw_tile = _pick_stage1_tiles(N, Cin, HW, itemsize, budget)
    else:
        cin_tile, hw_tile = stage1_tiles
    num_k = Cin // cin_tile            # cin_tile always divides Cin (or equals it)
    num_hw = pl.cdiv(HW, hw_tile)
    p_split = 2 if (num_hw % 2 == 0 and num_hw >= 2) else 1
    hw_bpp = num_hw // p_split

    x_blk = N * cin_tile * hw_tile * itemsize
    w_blk = cin_tile * Cout * 4
    o_blk = N * Cout * 4
    stage1_vmem = int(min(max(2 * (x_blk + w_blk + o_blk) + (2 << 20), 16 << 20),
                          vmem_limit))

    partials = pl.pallas_call(
        _make_stage1_kernel(HW, hw_tile, hw_bpp),
        out_shape=jax.ShapeDtypeStruct((p_split, N, Cout), jnp.float32),
        grid_spec=pltpu.PrefetchScalarGridSpec(
            num_scalar_prefetch=0,
            grid=(p_split, num_k, hw_bpp),
            in_specs=[
                pl.BlockSpec((N, cin_tile, hw_tile),
                             lambda p, k, h: (0, k, p * hw_bpp + h)),
                pl.BlockSpec((cin_tile, Cout), lambda p, k, h: (k, 0)),
            ],
            out_specs=pl.BlockSpec((1, N, Cout), lambda p, k, h: (p, 0, 0)),
        ),
        compiler_params=pltpu.CompilerParams(
            # Leading HW-split axis shards the dominant HBM read across the
            # two v7x TensorCores; Cin / HW axes are reductions.
            dimension_semantics=("parallel", "arbitrary", "arbitrary"),
            vmem_limit_bytes=stage1_vmem,
        ),
    )(x3, w_folded)

    # ---- Stage 2: sum partials + bias + ReLU, broadcast across H*W -----------
    # TODO(synk): in the full ASPP module, skip this stage and fuse the
    # broadcast of the (N, Cout) pooled vector into the concat/1x1-projection
    # consumer -- it removes N*Cout*H*W redundant HBM bytes.
    hw2_tile = stage2_tile if stage2_tile is not None else _pick_stage2_tile(
        N, Cout, HW, itemsize, budget)
    num_j = pl.cdiv(HW, hw2_tile)
    o2_blk = N * Cout * hw2_tile * itemsize
    in2_blk = p_split * N * Cout * 4 + Cout * 4
    stage2_vmem = int(min(max(2 * (o2_blk + in2_blk) + (2 << 20), 16 << 20),
                          vmem_limit))

    out3 = pl.pallas_call(
        _stage2_kernel,
        out_shape=jax.ShapeDtypeStruct((N, Cout, HW), x.dtype),
        grid_spec=pltpu.PrefetchScalarGridSpec(
            num_scalar_prefetch=0,
            grid=(num_j,),
            in_specs=[
                pl.BlockSpec((p_split, N, Cout), lambda j: (0, 0, 0)),
                pl.BlockSpec((1, Cout), lambda j: (0, 0)),
            ],
            out_specs=pl.BlockSpec((N, Cout, hw2_tile), lambda j: (0, 0, j)),
        ),
        compiler_params=pltpu.CompilerParams(
            dimension_semantics=("parallel",),   # store phase shardable on v7x
            vmem_limit_bytes=stage2_vmem,
        ),
    )(partials, bias)

    return out3.reshape(N, Cout, H, W)


# ----------------------------------------------------------------------------
# Reference + self-test
# ----------------------------------------------------------------------------
def _reference(x, weight, gamma, beta, running_mean, running_var, eps=1e-5):
    pooled = jnp.mean(x.astype(jnp.float32), axis=(2, 3))               # (N, Cin)
    y = pooled @ weight.T.astype(jnp.float32)                           # (N, Cout)
    scale = gamma / jnp.sqrt(running_var + eps)
    y = y * scale + (beta - running_mean * scale)
    y = jnp.maximum(y, 0.0)
    N, _, H, W = x.shape
    return jnp.broadcast_to(y[:, :, None, None], (N, y.shape[1], H, W)).astype(x.dtype)


if __name__ == "__main__":
    key = jax.random.PRNGKey(0)
    k_x, k_w, k_g, k_b, k_m, k_v = jax.random.split(key, 6)

    N, Cin, Cout, H, W = 2, 4, 4, 16, 16

    x = jax.random.normal(k_x, (N, Cin, H, W), dtype=jnp.float32)
    # Deterministic synthetic parameters (shapes from the module's __init__).
    weight = jax.random.normal(k_w, (Cout, Cin), dtype=jnp.float32) * 0.1   # Conv2d 1x1, bias=False
    gamma = 1.0 + 0.1 * jax.random.normal(k_g, (Cout,), dtype=jnp.float32)  # BN weight
    beta = 0.1 * jax.random.normal(k_b, (Cout,), dtype=jnp.float32)         # BN bias
    running_mean = 0.05 * jax.random.normal(k_m, (Cout,), dtype=jnp.float32)
    running_var = jnp.abs(1.0 + 0.1 * jax.random.normal(k_v, (Cout,), dtype=jnp.float32))

    ref = _reference(x, weight, gamma, beta, running_mean, running_var)

    # 1) Default auto-tiled path.
    out = aspp_pooling(x, weight, gamma, beta, running_mean, running_var)
    out = jax.block_until_ready(out)
    assert out.shape == (N, Cout, H, W)
    assert jnp.allclose(out, ref, atol=1e-4, rtol=1e-4)

    # 2) Forced small tiles on an odd spatial size: exercises the multi-block
    #    HW reduction, the ragged-tail masking, the P=2 parallel HW split and
    #    the ragged Stage-2 output store.
    H2 = W2 = 13
    x_odd = jax.random.normal(k_x, (N, Cin, H2, W2), dtype=jnp.float32)
    ref_odd = _reference(x_odd, weight, gamma, beta, running_mean, running_var)
    out_odd = aspp_pooling(x_odd, weight, gamma, beta, running_mean, running_var,
                           stage1_tiles=(Cin, 128), stage2_tile=128)
    out_odd = jax.block_until_ready(out_odd)
    assert out_odd.shape == (N, Cout, H2, W2)
    assert jnp.allclose(out_odd, ref_odd, atol=1e-4, rtol=1e-4)

    print("KERNEL_OK")
</pallas_src>

<mosaic_0001>
module attributes {stable_mosaic.version = 11 : i64} {
  func.func @kernel(%arg0: i32, %arg1: i32, %arg2: i32, %arg3: memref<2x4x256xf32, #tpu.memory_space<vmem>>, %arg4: memref<4x4xf32, #tpu.memory_space<vmem>>, %arg5: memref<1x2x4xf32, #tpu.memory_space<vmem>>) attributes {dimension_semantics = [#tpu.dimension_semantics<parallel>, #tpu.dimension_semantics<arbitrary>, #tpu.dimension_semantics<arbitrary>], iteration_bounds = array<i64: 1, 1, 1>, scalar_prefetch = 0 : i64, scratch_operands = 0 : i64, tpu.core_type = #tpu.core_type<tc>, window_params = [{transform_indices = @transform_0, window_bounds = array<i64: 2, 4, 256>}, {transform_indices = @transform_1, window_bounds = array<i64: 4, 4>}, {transform_indices = @transform_2, window_bounds = array<i64: 1, 2, 4>}]} {
    %c0_i32 = arith.constant 0 : i32
    %0 = arith.cmpi eq, %arg1, %c0_i32 : i32
    %c0_i32_0 = arith.constant 0 : i32
    %1 = arith.cmpi eq, %arg2, %c0_i32_0 : i32
    %2 = arith.andi %0, %1 : i1
    %3 = arith.extui %2 : i1 to i32
    %c0_i32_1 = arith.constant 0 : i32
    %4 = arith.cmpi ne, %3, %c0_i32_1 : i32
    scf.if %4 {
      %cst_13 = arith.constant 0.000000e+00 : f32
      %13 = vector.broadcast %cst_13 : f32 to vector<1x2x4xf32>
      %c0_14 = arith.constant 0 : index
      %c0_15 = arith.constant 0 : index
      %c0_16 = arith.constant 0 : index
      %14 = vector.load %arg5[%c0_14, %c0_15, %c0_16] : memref<1x2x4xf32, #tpu.memory_space<vmem>>, vector<1x2x4xf32>
      tpu.vector_store %arg5[%c0_14, %c0_15, %c0_16], %13 {strides = array<i32>} : memref<1x2x4xf32, #tpu.memory_space<vmem>>, vector<1x2x4xf32>,
    } else {
    }
    %c0 = arith.constant 0 : index
    %c0_2 = arith.constant 0 : index
    %c0_3 = arith.constant 0 : index
    %5 = vector.load %arg3[%c0, %c0_2, %c0_3] : memref<2x4x256xf32, #tpu.memory_space<vmem>>, vector<2x4x256xf32>
    %cst = arith.constant dense<0.000000e+00> : vector<2x4xf32>
    %6 = vector.multi_reduction <add>, %5, %cst [2] : vector<2x4x256xf32> to vector<2x4xf32>
    %c0_4 = arith.constant 0 : index
    %c0_5 = arith.constant 0 : index
    %c0_6 = arith.constant 0 : index
    %7 = vector.load %arg5[%c0_4, %c0_5, %c0_6] : memref<1x2x4xf32, #tpu.memory_space<vmem>>, vector<1x2x4xf32>
    %c0_7 = arith.constant 0 : index
    %c0_8 = arith.constant 0 : index
    %8 = vector.load %arg4[%c0_7, %c0_8] : memref<4x4xf32, #tpu.memory_space<vmem>>, vector<4x4xf32>
    %cst_9 = arith.constant dense<0.000000e+00> : vector<2x4xf32>
    %9 = tpu.matmul %6, %8, %cst_9 {dimension_numbers = #tpu.dot_dimension_numbers<[1], [0], [0], [1], [0, 0, 1, 1], [], []>} : vector<2x4xf32>, vector<4x4xf32>, vector<2x4xf32> -> vector<2x4xf32>
    %10 = vector.shape_cast %9 : vector<2x4xf32> to vector<1x2x4xf32>
    %11 = arith.addf %7, %10 : vector<1x2x4xf32>
    %c0_10 = arith.constant 0 : index
    %c0_11 = arith.constant 0 : index
    %c0_12 = arith.constant 0 : index
    %12 = vector.load %arg5[%c0_10, %c0_11, %c0_12] : memref<1x2x4xf32, #tpu.memory_space<vmem>>, vector<1x2x4xf32>
    tpu.vector_store %arg5[%c0_10, %c0_11, %c0_12], %11 {strides = array<i32>} : memref<1x2x4xf32, #tpu.memory_space<vmem>>, vector<1x2x4xf32>,
    return
  }
  func.func @transform_0(%arg0: i32, %arg1: i32, %arg2: i32) -> (i32, i32, i32) {
    %c1_i32 = arith.constant 1 : i32
    %0 = arith.muli %arg0, %c1_i32 : i32
    %1 = arith.addi %0, %arg2 : i32
    %c0_i32 = arith.constant 0 : i32
    %c0_i32_0 = arith.constant 0 : i32
    return %c0_i32, %arg1, %1 : i32, i32, i32
  }
  func.func @transform_1(%arg0: i32, %arg1: i32, %arg2: i32) -> (i32, i32) {
    %c0_i32 = arith.constant 0 : i32
    %c0_i32_0 = arith.constant 0 : i32
    return %arg1, %c0_i32 : i32, i32
  }
  func.func @transform_2(%arg0: i32, %arg1: i32, %arg2: i32) -> (i32, i32, i32) {
    %c0_i32 = arith.constant 0 : i32
    %c0_i32_0 = arith.constant 0 : i32
    %c0_i32_1 = arith.constant 0 : i32
    return %arg0, %c0_i32, %c0_i32_0 : i32, i32, i32
  }
}

</mosaic_0001>

<bundles_post_ra>
// kernel: tpu_custom_call.1
= control target key start
LH: loop header
LB: loop body
LE: loop exit
PB: predicated region body
PF: predicated region fallthrough
CT: control target
= control target key end

     0   :  { %7 = vsyncpa [#allocation3], 0  ;;  %s337_s0 = inlined_call_operand.hbm [shape: f32[2,4,256], index: 0, kind: input, shape index: {}]   ;;  %s338_s1 = inlined_call_operand.hbm [shape: f32[4,4], index: 1, kind: input, shape index: {}]   ;;  %s339_s2 = inlined_call_operand.hbm [shape: f32[1,2,4], index: 2, kind: output, shape index: {}]  }
   0x1   :  { %8 = vsyncpa [#allocation6], 0 }
   0x2   :  { %9 = vsyncpa [#allocation4], 0  ;;  %s272_s9 = smov [#allocation2]   ;;  %s200_s13 = scalar_lea.hbm %s337_s0, 256 }
   0x3   :  { %s19_s10 = sshll.u32 %s272_s9, 4  ;;  %p201_p0 = scmp.ne.s32.totalorder %s337_s0, %s200_s13  ;;  %s20_s10 = int_to_ptr.vmem [resolvable:$true] %s19_s10 }
   0x4   :  { %p204_p1 = scmp.lt.u32.totalorder %s200_s13, %s337_s0 }
   0x6   :  { %p206_p2 = pnand %p204_p1, %p201_p0 }
   0x8   :  { %209 = shalt.err (!%p206_p2)
}
   0x9   :  { %s210_s18 = scalar_lea.vmem %s20_s10, 256  ;;  %p215_p4 = scmp.lt.s32.totalorder %s20_s10, %s20_s10 }
   0xa   :  { %p211_p3 = scmp.ne.s32.totalorder %s20_s10, %s210_s18  ;;  %p216_p5 = scmp.lt.s32.totalorder %s210_s18, %s210_s18 }
   0xc   :  { %p217_p6 = por %p216_p5, %p215_p4 }
   0xe   :  { %p218_p7 = pnand %p217_p6, %p211_p3 }
  0x10   :  { %221 = shalt.err (!%p218_p7)
}
  0x11   :  { %s273_s19 = smov 128   ;;  %s274_s20 = smov 8  }
  0x12   :  { %25 = dma.hbm_to_vmem [thread:$0]  %s337_s0, 256, %s20_s10, [#allocation3], %s273_s19, %s273_s19, %s274_s20  }
  0x13   :  { %s275_s23 = smov [#allocation5]   ;;  %s222_s27 = scalar_lea.hbm %s338_s1, 64 }
  0x14   :  { %s32_s24 = sshll.u32 %s275_s23, 4  ;;  %p223_p8 = scmp.ne.s32.totalorder %s338_s1, %s222_s27  ;;  %s33_s24 = int_to_ptr.vmem [resolvable:$true] %s32_s24 }
  0x15   :  { %p226_p9 = scmp.lt.u32.totalorder %s222_s27, %s338_s1 }
  0x17   :  { %p228_p10 = pnand %p226_p9, %p223_p8 }
  0x19   :  { %231 = shalt.err (!%p228_p10)
}
  0x1a   :  { %s232_s4 = scalar_lea.vmem %s33_s24, 64  ;;  %p237_p12 = scmp.lt.s32.totalorder %s33_s24, %s33_s24 }
  0x1b   :  { %p233_p11 = scmp.ne.s32.totalorder %s33_s24, %s232_s4  ;;  %p238_p13 = scmp.lt.s32.totalorder %s232_s4, %s232_s4 }
  0x1d   :  { %p239_p0 = por %p238_p13, %p237_p12 }
  0x1f   :  { %p240_p1 = pnand %p239_p0, %p233_p11 }
  0x21   :  { %243 = shalt.err (!%p240_p1)
}
  0x22   :  { %35 = dma.hbm_to_vmem [thread:$0]  %s338_s1, 64, %s33_s24, [#allocation6]  }
  0x23   :  { %266 = dma.done.wait [#allocation3], 256  }
  0x24   :  { %267 = vsyncadd [#allocation3], 4294967040 }
  0x25   :  { %268 = dma.done.wait [#allocation6], 64  }
  0x26   :  { %269 = vsyncadd [#allocation6], 4294967232  ;;  %vm60_vm0 = vcmask 1043456   ;;  %v52_v0 = vld [vmem:[#allocation2] sm:$0xff]  ;;  %v53_v1 = vld [vmem:[#allocation2 + $0x8] sm:$0xff]  ;;  %vm50_vm1 = vcmask 25600   ;;  %v75_v12 = vlaneseq }
  0x27   :  { %v56_v2 = vcombine.high %v52_v0, %v52_v0  ;;  %v61_v3 = vsel %vm60_vm0, %v52_v0, 0.0  ;;  %v57_v4 = vcombine.high %v53_v1, %v53_v1  ;;  %v66_v6 = vsel %vm60_vm0, %v53_v1, 0.0  ;;  %v72_v10 = vld [vmem:[#allocation5] sm:$0xf]  ;;  %s278_s1 = smov [#allocation7]  }
  0x28   :  { %v276_v11 = vmov 0.0   ;;  %vm277_vm2 = vmmov 0   ;;  %v76_v13 = vand.u32 127, %v75_v12  ;;  %v78_v14 = vshrl.u32 %v75_v12, 7  ;;  %s172_s6 = sshll.u32 %s278_s1, 4  ;;  %s173_s6 = int_to_ptr.vmem [resolvable:$true] %s172_s6 }
  0x29   :  { %v62_v5 = vsel %vm60_vm0, %v56_v2, 0.0  ;;  %v67_v7 = vsel %vm60_vm0, %v57_v4, 0.0  ;;  %51 = vst.msk [vmem:[#allocation7] sm:$0x3] %vm50_vm1, %v276_v11  ;;  %186 = vmatprep.subr.mxu0 %v276_v11  ;;  %188 = vmatprep.mubr.msk.f32.mxu0 %vm277_vm2, %v276_v11  ;;  %vm85_vm3 = vcmask 1041409   ;;  %vm87_vm4 = vcmask 31744   ;;  %p249_p3 = scmp.lt.s32.totalorder %s173_s6, %s173_s6 }
  0x2a   :  { %v63_v8 = vadd.f32 %v62_v5, %v61_v3  ;;  %v68_v9 = vadd.f32 %v67_v7, %v66_v6  ;;  %187 = vmatpush3.msk.msra.mxu0 %vm60_vm0, %v72_v10  ;;  %v79_v16 = vsub.s32 %v76_v13, %v78_v14  ;;  %s244_s7 = scalar_lea.vmem %s173_s6, 32 }
  0x2b   :  { %p245_p2 = scmp.ne.s32.totalorder %s173_s6, %s244_s7  ;;  %p250_p4 = scmp.lt.s32.totalorder %s244_s7, %s244_s7 }
  0x2c   :  { %64 = vadd.xlane.f32.xlu0 %v63_v8 }
  0x2d   :  { %p251_p5 = por %p250_p4, %p249_p3 }
  0x2f   :  { %p252_p6 = pnand %p251_p5, %p245_p2 }
  0x30   :  { %69 = vadd.xlane.f32.xlu0 %v68_v9  ;;  %v71_v21 = vld [vmem:[#allocation7] sm:$0x3] }
  0xb9   :  { %v65_v15 = vpop.xlane.xlu0 %64 }
  0xba   :  { %v80_v18 = vrot.slane %v65_v15, %v79_v16 }
  0xbd   :  { %v70_v17 = vpop.xlane.xlu0 %69 }
  0xbe   :  { %v84_v19 = vrot.slane %v70_v17, %v79_v16 }
  0xc0   :  { %v86_v20 = vsel %vm85_vm3, %v84_v19, %v80_v18 }
  0xc1   :  { %189 = vmatmul.mubr.msk.f32.vlgmr.msra.gmra.mrb[0].mxu0 %vm87_vm4, %v86_v20 }
 0x194   :  { %v159_v22 = vpop.f32.mrb[0].mxu0 }
 0x195   :  { %v163_v23 = vadd.f32 %v159_v22, %v71_v21  ;;  %v190_v24 = vpop.f32.mrb[1].mxu0 }
 0x197   :  { %165 = vst.msk [vmem:[#allocation7] sm:$0x3] %vm50_vm1, %v163_v23 }
 0x198   :  { %255 = shalt.err (!%p252_p6)
}
 0x199   :  { %s256_s10 = scalar_lea.hbm %s339_s2, 32 }
 0x19a   :  { %p257_p7 = scmp.ne.s32.totalorder %s339_s2, %s256_s10  ;;  %p260_p8 = scmp.lt.u32.totalorder %s256_s10, %s339_s2 }
 0x19c   :  { %p262_p9 = pnand %p260_p8, %p257_p7 }
 0x19e   :  { %265 = shalt.err (!%p262_p9)
}
 0x19f   :  { %175 = dma.vmem_to_hbm [thread:$0]  %s173_s6, 32, %s339_s2, [#allocation4]  }
 0x1a0   :  { %270 = dma.done.wait [#allocation4], 32  }
 0x1a1   :  { %271 = vsyncadd [#allocation4], 4294967264 }
 0x1a2   :  { %179 = vsyncpa [#allocation3], 1 }
 0x1a3   :  { %180 = vsyncpa [#allocation6], 1 }
 0x1a4   :  { %181 = vsyncpa [#allocation4], 1 }

</bundles_post_ra>
